<compile_context>
chip_gen: v7x
topology: tpu7x:2x2x1
jax: 0.10.0
libtpu: 0.0.40
codegen_flags: <defaults>
</compile_context>

<pallas_src>
import functools

import jax
import jax.numpy as jnp
from jax.experimental import pallas as pl
from jax.experimental.pallas import tpu as pltpu

# Combined (pred + target) HBM bytes streamed per grid step.
_STEP_BYTES = 8 * 1024 * 1024
_LANE_W = 512


def _manhattan_kernel(p_ref, t_ref, acc_ref, *, block_rows, blocks_per_core,
                      rows, lane):
    """Accumulate sum(|p - t|) of one (block_rows, lane) tile into acc_ref.

    acc_ref: (1, 8, lane) f32 VMEM output block, resident across the inner
    ("arbitrary") grid axis -> this core's vreg-shaped accumulator.
    """
    i = pl.program_id(1)

    @pl.when(i == 0)
    def _init():
        acc_ref[...] = jnp.zeros_like(acc_ref)

    logical_block = pl.program_id(0) * blocks_per_core + i
    block_start = logical_block * block_rows

    def _accumulate(diff):
        # (block_rows, lane) -> (block_rows//8, 8, lane) is tile-aligned, so
        # the axis-0 sum is pure VPU adds across lane//128 independent vregs.
        partial = diff.reshape(block_rows // 8, 8, lane).sum(axis=0)
        acc_ref[...] = acc_ref[...] + partial[None, :, :]

    # Fast path: block fully inside the real array -> no iota/compare/select.
    @pl.when(block_start + block_rows <= rows)
    def _full():
        _accumulate(jnp.abs(p_ref[...].astype(jnp.float32) -
                            t_ref[...].astype(jnp.float32)))

    # Slow path: partial last block, or the clamped duplicate block a second
    # core re-reads when num_blocks is odd (all its row ids are >= rows).
    @pl.when(block_start + block_rows > rows)
    def _masked():
        diff = jnp.abs(p_ref[...].astype(jnp.float32) -
                       t_ref[...].astype(jnp.float32))
        row_ids = block_start + jax.lax.broadcasted_iota(jnp.int32, diff.shape, 0)
        _accumulate(jnp.where(row_ids < rows, diff, jnp.float32(0.0)))


def _num_tensorcores():
    # Only multi-TensorCore generations benefit from the leading core axis;
    # on 1-TC chips (v5e/v6e) it would just be a serial outer loop.
    try:
        kind = (jax.devices()[0].device_kind or "").lower()
    except Exception:
        return 1
    return 2 if ("v7" in kind or "v4" in kind) else 1


def manhattan_distance(pred, target):
    assert pred.shape == target.shape, "pred/target must have identical shapes"
    p = pred.reshape(-1)
    t = target.reshape(-1)
    n = p.shape[0]

    itemsize_p = int(jnp.dtype(p.dtype).itemsize)
    itemsize_t = int(jnp.dtype(t.dtype).itemsize)
    # Sublane granularity: 8 for 4-byte dtypes, 16 for bf16, 32 for 1-byte.
    sub = max(8, 32 // min(itemsize_p, itemsize_t))

    # Wider lanes -> more ILP on the reduction; fall back for tiny inputs.
    lane = _LANE_W if n >= sub * _LANE_W else 128

    # Main region: multiple of (sub * lane) elements so `rows` is a clean
    # multiple of the sublane granularity; the small tail stays in plain JAX
    # (never pad / copy the full inputs in HBM).
    tile_elems = sub * lane
    n_main = (n // tile_elems) * tile_elems
    tail = jnp.sum(jnp.abs(p[n_main:].astype(jnp.float32) -
                           t[n_main:].astype(jnp.float32)))
    if n_main == 0:
        return tail

    rows = n_main // lane
    p2 = p[:n_main].reshape(rows, lane)
    t2 = t[:n_main].reshape(rows, lane)

    # Block rows from the byte budget (scales with dtype width), rounded to the
    # sublane granularity and clamped to the real row count.
    budget_rows = _STEP_BYTES // (lane * (itemsize_p + itemsize_t))
    block_rows = max(sub, (budget_rows // sub) * sub)
    block_rows = min(block_rows, rows)
    num_blocks = pl.cdiv(rows, block_rows)

    n_cores = _num_tensorcores() if num_blocks >= 2 else 1
    blocks_per_core = pl.cdiv(num_blocks, n_cores)

    def in_map(c, i):
        # Clamp so the DMA window always starts inside the array; the kernel
        # zeroes any rows beyond `rows` (partial / duplicate blocks).
        return (jnp.minimum(c * blocks_per_core + i, num_blocks - 1), 0)

    kernel = functools.partial(
        _manhattan_kernel,
        block_rows=block_rows,
        blocks_per_core=blocks_per_core,
        rows=rows,
        lane=lane,
    )

    # 2 inputs x 2 pipeline buffers x block, plus accumulator/output slack.
    block_bytes = block_rows * lane * (itemsize_p + itemsize_t)
    vmem_limit = int(min(max(2 * block_bytes + (4 << 20), 16 << 20), 32 << 20))

    partials = pl.pallas_call(
        kernel,
        out_shape=jax.ShapeDtypeStruct((n_cores, 8, lane), jnp.float32),
        grid=(n_cores, blocks_per_core),
        in_specs=[
            pl.BlockSpec((block_rows, lane), in_map),
            pl.BlockSpec((block_rows, lane), in_map),
        ],
        out_specs=pl.BlockSpec((1, 8, lane), lambda c, i: (c, 0, 0)),
        compiler_params=pltpu.CompilerParams(
            dimension_semantics=("parallel", "arbitrary"),
            vmem_limit_bytes=vmem_limit),
    )(p2, t2)

    return jnp.sum(partials) + tail


if __name__ == "__main__":
    key = jax.random.PRNGKey(0)
    k1, k2, k3, k4 = jax.random.split(key, 4)

    # Small image-like regression tensors (primary check).
    pred = jax.random.normal(k1, (2, 4, 16, 16), dtype=jnp.float32)
    target = jax.random.normal(k2, (2, 4, 16, 16), dtype=jnp.float32)
    loss = jax.block_until_ready(manhattan_distance(pred, target))
    ref = jnp.sum(jnp.abs(pred - target))   # == torch.mean((p - t).abs().sum())
    assert jnp.allclose(loss, ref, rtol=1e-5, atol=1e-5), (loss, ref)

    # Larger check exercising the multi-block, partial-last-block (masked) path.
    pred2 = jax.random.normal(k3, (4, 4, 256, 288), dtype=jnp.float32)
    target2 = jax.random.normal(k4, (4, 4, 256, 288), dtype=jnp.float32)
    loss2 = jax.block_until_ready(manhattan_distance(pred2, target2))
    ref2 = jnp.sum(jnp.abs(pred2 - target2))
    assert jnp.allclose(loss2, ref2, rtol=1e-4, atol=1e-2), (loss2, ref2)

    print("KERNEL_OK")
</pallas_src>

<mosaic_0001>
module attributes {stable_mosaic.version = 11 : i64} {
  func.func @_manhattan_kernel(%arg0: i32, %arg1: i32, %arg2: memref<16x128xf32, #tpu.memory_space<vmem>>, %arg3: memref<16x128xf32, #tpu.memory_space<vmem>>, %arg4: memref<1x8x128xf32, #tpu.memory_space<vmem>>) attributes {dimension_semantics = [#tpu.dimension_semantics<parallel>, #tpu.dimension_semantics<arbitrary>], iteration_bounds = array<i64: 1, 1>, scalar_prefetch = 0 : i64, scratch_operands = 0 : i64, tpu.core_type = #tpu.core_type<tc>, window_params = [{transform_indices = @transform_0, window_bounds = array<i64: 16, 128>}, {transform_indices = @transform_1, window_bounds = array<i64: 16, 128>}, {transform_indices = @transform_2, window_bounds = array<i64: 1, 8, 128>}]} {
    %c0_i32 = arith.constant 0 : i32
    %0 = arith.cmpi eq, %arg1, %c0_i32 : i32
    %1 = arith.extui %0 : i1 to i32
    %c0_i32_0 = arith.constant 0 : i32
    %2 = arith.cmpi ne, %1, %c0_i32_0 : i32
    scf.if %2 {
      %cst = arith.constant 0.000000e+00 : f32
      %14 = vector.broadcast %cst : f32 to vector<1x8x128xf32>
      %c0 = arith.constant 0 : index
      %c0_7 = arith.constant 0 : index
      %c0_8 = arith.constant 0 : index
      %15 = vector.load %arg4[%c0, %c0_7, %c0_8] : memref<1x8x128xf32, #tpu.memory_space<vmem>>, vector<1x8x128xf32>
      tpu.vector_store %arg4[%c0, %c0_7, %c0_8], %14 {strides = array<i32>} : memref<1x8x128xf32, #tpu.memory_space<vmem>>, vector<1x8x128xf32>,
    } else {
    }
    %c1_i32 = arith.constant 1 : i32
    %3 = arith.muli %arg0, %c1_i32 : i32
    %4 = arith.addi %3, %arg1 : i32
    %c16_i32 = arith.constant 16 : i32
    %5 = arith.muli %4, %c16_i32 : i32
    %c16_i32_1 = arith.constant 16 : i32
    %6 = arith.addi %5, %c16_i32_1 : i32
    %c16_i32_2 = arith.constant 16 : i32
    %7 = arith.cmpi sle, %6, %c16_i32_2 : i32
    %8 = arith.extui %7 : i1 to i32
    %c0_i32_3 = arith.constant 0 : i32
    %9 = arith.cmpi ne, %8, %c0_i32_3 : i32
    scf.if %9 {
      %c0 = arith.constant 0 : index
      %c0_7 = arith.constant 0 : index
      %14 = vector.load %arg2[%c0, %c0_7] : memref<16x128xf32, #tpu.memory_space<vmem>>, vector<16x128xf32>
      %c0_8 = arith.constant 0 : index
      %c0_9 = arith.constant 0 : index
      %15 = vector.load %arg3[%c0_8, %c0_9] : memref<16x128xf32, #tpu.memory_space<vmem>>, vector<16x128xf32>
      %16 = arith.subf %14, %15 : vector<16x128xf32>
      %17 = math.absf %16 : vector<16x128xf32>
      %18 = vector.shape_cast %17 : vector<16x128xf32> to vector<2x8x128xf32>
      %cst = arith.constant dense<0.000000e+00> : vector<8x128xf32>
      %19 = vector.multi_reduction <add>, %18, %cst [0] : vector<2x8x128xf32> to vector<8x128xf32>
      %c0_10 = arith.constant 0 : index
      %c0_11 = arith.constant 0 : index
      %c0_12 = arith.constant 0 : index
      %20 = vector.load %arg4[%c0_10, %c0_11, %c0_12] : memref<1x8x128xf32, #tpu.memory_space<vmem>>, vector<1x8x128xf32>
      %21 = vector.shape_cast %19 : vector<8x128xf32> to vector<1x8x128xf32>
      %22 = arith.addf %20, %21 : vector<1x8x128xf32>
      %c0_13 = arith.constant 0 : index
      %c0_14 = arith.constant 0 : index
      %c0_15 = arith.constant 0 : index
      %23 = vector.load %arg4[%c0_13, %c0_14, %c0_15] : memref<1x8x128xf32, #tpu.memory_space<vmem>>, vector<1x8x128xf32>
      tpu.vector_store %arg4[%c0_13, %c0_14, %c0_15], %22 {strides = array<i32>} : memref<1x8x128xf32, #tpu.memory_space<vmem>>, vector<1x8x128xf32>,
    } else {
    }
    %c16_i32_4 = arith.constant 16 : i32
    %10 = arith.addi %5, %c16_i32_4 : i32
    %c16_i32_5 = arith.constant 16 : i32
    %11 = arith.cmpi sgt, %10, %c16_i32_5 : i32
    %12 = arith.extui %11 : i1 to i32
    %c0_i32_6 = arith.constant 0 : i32
    %13 = arith.cmpi ne, %12, %c0_i32_6 : i32
    scf.if %13 {
      %c0 = arith.constant 0 : index
      %c0_7 = arith.constant 0 : index
      %14 = vector.load %arg2[%c0, %c0_7] : memref<16x128xf32, #tpu.memory_space<vmem>>, vector<16x128xf32>
      %c0_8 = arith.constant 0 : index
      %c0_9 = arith.constant 0 : index
      %15 = vector.load %arg3[%c0_8, %c0_9] : memref<16x128xf32, #tpu.memory_space<vmem>>, vector<16x128xf32>
      %16 = arith.subf %14, %15 : vector<16x128xf32>
      %17 = math.absf %16 : vector<16x128xf32>
      %18 = tpu.iota {dimensions = array<i32: 0>} : vector<16x128xi32>
      %19 = vector.broadcast %5 : i32 to vector<16x128xi32>
      %20 = arith.addi %19, %18 : vector<16x128xi32>
      %c16_i32_10 = arith.constant 16 : i32
      %21 = vector.broadcast %c16_i32_10 : i32 to vector<16x128xi32>
      %22 = arith.cmpi slt, %20, %21 : vector<16x128xi32>
      %cst = arith.constant 0.000000e+00 : f32
      %23 = vector.broadcast %cst : f32 to vector<16x128xf32>
      %24 = arith.select %22, %17, %23 : vector<16x128xi1>, vector<16x128xf32>
      %25 = vector.shape_cast %24 : vector<16x128xf32> to vector<2x8x128xf32>
      %cst_11 = arith.constant dense<0.000000e+00> : vector<8x128xf32>
      %26 = vector.multi_reduction <add>, %25, %cst_11 [0] : vector<2x8x128xf32> to vector<8x128xf32>
      %c0_12 = arith.constant 0 : index
      %c0_13 = arith.constant 0 : index
      %c0_14 = arith.constant 0 : index
      %27 = vector.load %arg4[%c0_12, %c0_13, %c0_14] : memref<1x8x128xf32, #tpu.memory_space<vmem>>, vector<1x8x128xf32>
      %28 = vector.shape_cast %26 : vector<8x128xf32> to vector<1x8x128xf32>
      %29 = arith.addf %27, %28 : vector<1x8x128xf32>
      %c0_15 = arith.constant 0 : index
      %c0_16 = arith.constant 0 : index
      %c0_17 = arith.constant 0 : index
      %30 = vector.load %arg4[%c0_15, %c0_16, %c0_17] : memref<1x8x128xf32, #tpu.memory_space<vmem>>, vector<1x8x128xf32>
      tpu.vector_store %arg4[%c0_15, %c0_16, %c0_17], %29 {strides = array<i32>} : memref<1x8x128xf32, #tpu.memory_space<vmem>>, vector<1x8x128xf32>,
    } else {
    }
    return
  }
  func.func @transform_0(%arg0: i32, %arg1: i32) -> (i32, i32) {
    %c1_i32 = arith.constant 1 : i32
    %0 = arith.muli %arg0, %c1_i32 : i32
    %1 = arith.addi %0, %arg1 : i32
    %c0_i32 = arith.constant 0 : i32
    %2 = arith.minsi %1, %c0_i32 : i32
    %c0_i32_0 = arith.constant 0 : i32
    %c0_i32_1 = arith.constant 0 : i32
    return %2, %c0_i32_0 : i32, i32
  }
  func.func @transform_1(%arg0: i32, %arg1: i32) -> (i32, i32) {
    %c1_i32 = arith.constant 1 : i32
    %0 = arith.muli %arg0, %c1_i32 : i32
    %1 = arith.addi %0, %arg1 : i32
    %c0_i32 = arith.constant 0 : i32
    %2 = arith.minsi %1, %c0_i32 : i32
    %c0_i32_0 = arith.constant 0 : i32
    %c0_i32_1 = arith.constant 0 : i32
    return %2, %c0_i32_0 : i32, i32
  }
  func.func @transform_2(%arg0: i32, %arg1: i32) -> (i32, i32, i32) {
    %c0_i32 = arith.constant 0 : i32
    %c0_i32_0 = arith.constant 0 : i32
    %c0_i32_1 = arith.constant 0 : i32
    return %arg0, %c0_i32, %c0_i32_0 : i32, i32, i32
  }
}

</mosaic_0001>

<bundles_post_ra>
// kernel: tpu_custom_call.1
= control target key start
LH: loop header
LB: loop body
LE: loop exit
PB: predicated region body
PF: predicated region fallthrough
CT: control target
= control target key end

     0   :  { %7 = vsyncpa [#allocation3], 0  ;;  %s264_s0 = inlined_call_operand.hbm [shape: f32[16,128], index: 0, kind: input, shape index: {}]   ;;  %s265_s1 = inlined_call_operand.hbm [shape: f32[16,128], index: 1, kind: input, shape index: {}]   ;;  %s266_s2 = inlined_call_operand.hbm [shape: f32[1,8,128], index: 2, kind: output, shape index: {}]  }
   0x1   :  { %8 = vsyncpa [#allocation6], 0 }
   0x2   :  { %9 = vsyncpa [#allocation4], 0  ;;  %s208_s9 = smov [#allocation2]   ;;  %s136_s13 = scalar_lea.hbm %s264_s0, 256 }
   0x3   :  { %s21_s10 = sshll.u32 %s208_s9, 4  ;;  %p137_p0 = scmp.ne.s32.totalorder %s264_s0, %s136_s13  ;;  %s22_s10 = int_to_ptr.vmem [resolvable:$true] %s21_s10 }
   0x4   :  { %p140_p1 = scmp.lt.u32.totalorder %s136_s13, %s264_s0 }
   0x6   :  { %p142_p2 = pnand %p140_p1, %p137_p0 }
   0x8   :  { %145 = shalt.err (!%p142_p2)
}
   0x9   :  { %s146_s18 = scalar_lea.vmem %s22_s10, 256  ;;  %p151_p4 = scmp.lt.s32.totalorder %s22_s10, %s22_s10 }
   0xa   :  { %p147_p3 = scmp.ne.s32.totalorder %s22_s10, %s146_s18  ;;  %p152_p5 = scmp.lt.s32.totalorder %s146_s18, %s146_s18 }
   0xc   :  { %p153_p6 = por %p152_p5, %p151_p4 }
   0xe   :  { %p154_p7 = pnand %p153_p6, %p147_p3 }
  0x10   :  { %157 = shalt.err (!%p154_p7)
}
  0x11   :  { %s209_s19 = smov 128   ;;  %s210_s20 = smov 8  }
  0x12   :  { %27 = dma.hbm_to_vmem [thread:$0]  %s264_s0, 256, %s22_s10, [#allocation3], %s209_s19, %s209_s19, %s210_s20  }
  0x13   :  { %s211_s23 = smov [#allocation5]   ;;  %s158_s27 = scalar_lea.hbm %s265_s1, 256 }
  0x14   :  { %s39_s24 = sshll.u32 %s211_s23, 4  ;;  %p159_p8 = scmp.ne.s32.totalorder %s265_s1, %s158_s27  ;;  %s40_s24 = int_to_ptr.vmem [resolvable:$true] %s39_s24 }
  0x15   :  { %p162_p9 = scmp.lt.u32.totalorder %s158_s27, %s265_s1 }
  0x17   :  { %p164_p10 = pnand %p162_p9, %p159_p8 }
  0x19   :  { %167 = shalt.err (!%p164_p10)
}
  0x1a   :  { %s168_s4 = scalar_lea.vmem %s40_s24, 256  ;;  %p173_p12 = scmp.lt.s32.totalorder %s40_s24, %s40_s24 }
  0x1b   :  { %p169_p11 = scmp.ne.s32.totalorder %s40_s24, %s168_s4  ;;  %p174_p13 = scmp.lt.s32.totalorder %s168_s4, %s168_s4 }
  0x1d   :  { %p175_p0 = por %p174_p13, %p173_p12 }
  0x1f   :  { %p176_p1 = pnand %p175_p0, %p169_p11 }
  0x21   :  { %179 = shalt.err (!%p176_p1)
}
  0x22   :  { %45 = dma.hbm_to_vmem [thread:$0]  %s265_s1, 256, %s40_s24, [#allocation6], %s209_s19, %s209_s19, %s210_s20  }
  0x23   :  { %202 = dma.done.wait [#allocation3], 256  }
  0x24   :  { %203 = vsyncadd [#allocation3], 4294967040 }
  0x25   :  { %204 = dma.done.wait [#allocation6], 256  }
  0x26   :  { %205 = vsyncadd [#allocation6], 4294967040  ;;  %v72_v0 = vld [vmem:[#allocation2] sm:$0xff]  ;;  %v73_v1 = vld [vmem:[#allocation2 + $0x8] sm:$0xff]  ;;  %s212_s6 = smov [#allocation7]  }
  0x27   :  { %v74_v2 = vld [vmem:[#allocation5] sm:$0xff]  ;;  %v75_v3 = vld [vmem:[#allocation5 + $0x8] sm:$0xff]  ;;  %s116_s7 = sshll.u32 %s212_s6, 4  ;;  %s117_s7 = int_to_ptr.vmem [resolvable:$true] %s116_s7 }
  0x28   :  { %v76_v4 = vsub.f32 %v72_v0, %v74_v2  ;;  %v77_v5 = vsub.f32 %v73_v1, %v75_v3  ;;  %s180_s8 = scalar_lea.vmem %s117_s7, 128  ;;  %p185_p3 = scmp.lt.s32.totalorder %s117_s7, %s117_s7 }
  0x29   :  { %p181_p2 = scmp.ne.s32.totalorder %s117_s7, %s180_s8  ;;  %p186_p4 = scmp.lt.s32.totalorder %s180_s8, %s180_s8 }
  0x2a   :  { %v78_v6 = vand.u32 2147483647, %v76_v4  ;;  %v79_v7 = vand.u32 2147483647, %v77_v5 }
  0x2b   :  { %p187_p5 = por %p186_p4, %p185_p3 }
  0x2c   :  { %v80_v8 = vadd.f32 %v79_v7, %v78_v6 }
  0x2d   :  { %p188_p6 = pnand %p187_p5, %p181_p2 }
  0x2e   :  { %83 = vst [vmem:[#allocation7] sm:$0xff] %v80_v8 }
  0x2f   :  { %191 = shalt.err (!%p188_p6)
}
  0x30   :  { %s192_s10 = scalar_lea.hbm %s266_s2, 128 }
  0x31   :  { %p193_p7 = scmp.ne.s32.totalorder %s266_s2, %s192_s10  ;;  %p196_p8 = scmp.lt.u32.totalorder %s192_s10, %s266_s2 }
  0x33   :  { %p198_p9 = pnand %p196_p8, %p193_p7 }
  0x35   :  { %201 = shalt.err (!%p198_p9)
}
  0x36   :  { %119 = dma.vmem_to_hbm [thread:$0]  %s117_s7, 128, %s266_s2, [#allocation4]  }
  0x37   :  { %206 = dma.done.wait [#allocation4], 128  }
  0x38   :  { %207 = vsyncadd [#allocation4], 4294967168 }
  0x39   :  { %123 = vsyncpa [#allocation3], 1 }
  0x3a   :  { %124 = vsyncpa [#allocation6], 1 }
  0x3b   :  { %125 = vsyncpa [#allocation4], 1 }

</bundles_post_ra>
